<compile_context>
chip_gen: v7x
topology: tpu7x:2x2x1
jax: 0.10.0
libtpu: 0.0.40
codegen_flags: <defaults>
</compile_context>

<pallas_src>
import jax
import jax.numpy as jnp
import numpy as np
from jax import lax
from jax.experimental import pallas as pl
from jax.experimental.pallas import tpu as pltpu


def _round_up(x, m):
    return ((x + m - 1) // m) * m


# --------------------------------------------------------------------------
# Kernels
# --------------------------------------------------------------------------
def _fused_packed_kernel(x_ref, w1_ref, w2_ref, b_ref, o_ref):
    """Packed path (H <= 128).

    x_ref  : (tm, 2*g*H)   g packed rows of cat([x1, x2], -1)
    w1_ref : (2*g*H, 2*g*H) block-diag of 2g copies of W_one, (out, in) layout
    w2_ref : (g*H, 2*g*H)   block-diag of g copies of W_sim,  (out, in) layout
    b_ref  : (1, g*H)       tiled bias, f32
    o_ref  : (tm, g*H)      packed output rows
    """
    dn = (((1,), (1,)), ((), ()))          # y = x @ W.T  (contract with "in")
    h = lax.dot_general(x_ref[...], w1_ref[...], dn,
                        preferred_element_type=jnp.float32)
    h = jnp.where(h > 0, h, jnp.float32(0.01) * h)          # LeakyReLU in f32
    h = h.astype(x_ref.dtype)              # no-op for f32; bf16 MXU path else
    out = lax.dot_general(h, w2_ref[...], dn,
                          preferred_element_type=jnp.float32)
    out = out + b_ref[...]
    o_ref[...] = out.astype(o_ref.dtype)


def _wide_kernel(x1_ref, x2_ref, w1_ref, wa_ref, wb_ref, b_ref, o_ref):
    """Fallback path (H > 128): W_sim split into halves, no concat."""
    dn = (((1,), (1,)), ((), ()))
    w1 = w1_ref[...]
    h1 = lax.dot_general(x1_ref[...], w1, dn,
                         preferred_element_type=jnp.float32)
    h1 = jnp.where(h1 > 0, h1, jnp.float32(0.01) * h1).astype(x1_ref.dtype)
    h2 = lax.dot_general(x2_ref[...], w1, dn,
                         preferred_element_type=jnp.float32)
    h2 = jnp.where(h2 > 0, h2, jnp.float32(0.01) * h2).astype(x2_ref.dtype)
    out = lax.dot_general(h1, wa_ref[...], dn,
                          preferred_element_type=jnp.float32)
    out = out + lax.dot_general(h2, wb_ref[...], dn,
                                preferred_element_type=jnp.float32)
    out = out + b_ref[...]
    o_ref[...] = out.astype(o_ref.dtype)


# --------------------------------------------------------------------------
# Wrapper
# --------------------------------------------------------------------------
def crime_similarity_forward(feature_1, feature_2, w_one, w_sim, b_sim, *,
                             target_tile_bytes=2 * 1024 * 1024):
    """Fused Pallas forward.  feature_* : (..., H); returns (..., H)."""
    H = feature_1.shape[-1]
    lead = feature_1.shape[:-1]
    dtype = feature_1.dtype
    act_size = jnp.dtype(dtype).itemsize

    x1 = feature_1.reshape(-1, H)
    x2 = feature_2.reshape(-1, H).astype(dtype)
    N = x1.shape[0]

    # Align weight dtype with the activations ONCE in the wrapper (not per
    # grid step); keep the bias in f32 for the f32 accumulator add.
    w_one = w_one.astype(dtype)
    w_sim = w_sim.astype(dtype)
    b_f32 = b_sim.astype(jnp.float32)

    VMEM_BUDGET = 24 * 1024 * 1024          # safe on v7x (64 MiB physical)
    VMEM_CAP = 48 * 1024 * 1024
    RAISE_THRESHOLD = 10 * 1024 * 1024      # v5e default scoped limit is 16 MiB

    cost = pl.CostEstimate(
        flops=8 * N * H * H,
        transcendentals=0,
        bytes_accessed=int(3 * N * H * act_size + (3 * H * H + H) * act_size))

    if H <= 128:
        # ---------------- lane-dense packed path ----------------
        g = 128 // H if (128 % H == 0) else 1
        in_w = 2 * g * H
        out_w = g * H

        Np = _round_up(N, 8 * g)            # whole packed sublane groups
        if Np != N:
            pad = ((0, Np - N), (0, 0))
            x1 = jnp.pad(x1, pad)
            x2 = jnp.pad(x2, pad)
        # Single input stream: [x1[r] | x2[r]] rows, g rows packed per lane row.
        x_packed = jnp.concatenate([x1, x2], axis=-1).reshape(Np // g, in_w)
        rows = Np // g

        # Block-diagonal weights fold cat() and row-packing into the matmuls.
        w1_big = jnp.kron(jnp.eye(2 * g, dtype=dtype), w_one)     # (in_w, in_w)
        w2_big = jnp.kron(jnp.eye(g, dtype=dtype), w_sim)         # (out_w, in_w)
        b_big = jnp.tile(b_f32, g).reshape(1, out_w)

        # Bytes-targeted row tile (~target_tile_bytes per streamed input buf).
        row_bytes = in_w * act_size
        tm = _round_up(max(target_tile_bytes // row_bytes, 1), 8)
        tm = max(min(tm, _round_up(rows, 8)), 8)
        if rows > 8 and pl.cdiv(rows, tm) < 2:      # keep 2 tiles for v7x TCs
            tm = _round_up(pl.cdiv(rows, 2), 8)

        def vmem_bytes(t):
            streamed = 2 * t * (in_w + out_w) * act_size      # x/out, dbl-buf
            resident = 2 * (in_w * in_w + out_w * in_w) * act_size \
                + 2 * out_w * 4                               # weights + bias
            interm = t * (in_w + out_w) * 4                   # f32 h, f32 out
            return streamed + resident + interm

        while tm > 8 and vmem_bytes(tm) > VMEM_BUDGET:
            tm = _round_up(max(tm // 2, 8), 8)
        n_tiles = pl.cdiv(rows, tm)

        ckw = dict(dimension_semantics=("parallel",))
        est = vmem_bytes(tm)
        if est > RAISE_THRESHOLD:
            ckw["vmem_limit_bytes"] = int(min(2 * est, VMEM_CAP))

        out_p = pl.pallas_call(
            _fused_packed_kernel,
            out_shape=jax.ShapeDtypeStruct((rows, out_w), dtype),
            grid=(n_tiles,),
            in_specs=[
                pl.BlockSpec((tm, in_w), lambda i: (i, 0)),     # packed rows
                pl.BlockSpec((in_w, in_w), lambda i: (0, 0)),   # W1_big (res.)
                pl.BlockSpec((out_w, in_w), lambda i: (0, 0)),  # W2_big (res.)
                pl.BlockSpec((1, out_w), lambda i: (0, 0)),     # bias
            ],
            out_specs=pl.BlockSpec((tm, out_w), lambda i: (i, 0)),
            compiler_params=pltpu.CompilerParams(**ckw),
            cost_estimate=cost,
        )(x_packed, w1_big, w2_big, b_big)

        out = out_p.reshape(Np, H)[:N]      # contiguous reshape + row slice
    else:
        # ---------------- fallback path (H > 128) ----------------
        # TODO(synk): for very large H on v7x, stream W tiles over a K-axis
        # grid dimension instead of keeping all three HxH weights resident.
        w_a = w_sim[:, :H]
        w_b = w_sim[:, H:]
        b2 = b_f32.reshape(1, H)

        row_bytes = H * act_size
        tm = _round_up(max(target_tile_bytes // row_bytes, 1), 8)
        tm = max(min(tm, _round_up(N, 8)), 8)
        if N > 8 and pl.cdiv(N, tm) < 2:
            tm = _round_up(pl.cdiv(N, 2), 8)

        def vmem_bytes(t):
            streamed = 2 * t * 3 * H * act_size               # x1, x2, out
            resident = 2 * 3 * H * H * act_size + 2 * H * 4
            interm = 3 * t * H * 4                            # h1, h2, out f32
            return streamed + resident + interm

        while tm > 8 and vmem_bytes(tm) > VMEM_BUDGET:
            tm = _round_up(max(tm // 2, 8), 8)
        n_tiles = pl.cdiv(N, tm)

        ckw = dict(dimension_semantics=("parallel",))
        est = vmem_bytes(tm)
        if est > RAISE_THRESHOLD:
            ckw["vmem_limit_bytes"] = int(min(2 * est, VMEM_CAP))

        out = pl.pallas_call(
            _wide_kernel,
            out_shape=jax.ShapeDtypeStruct((N, H), dtype),
            grid=(n_tiles,),
            in_specs=[
                pl.BlockSpec((tm, H), lambda i: (i, 0)),        # x1 row tile
                pl.BlockSpec((tm, H), lambda i: (i, 0)),        # x2 row tile
                pl.BlockSpec((H, H), lambda i: (0, 0)),         # W_one
                pl.BlockSpec((H, H), lambda i: (0, 0)),         # W_sim[:, :H]
                pl.BlockSpec((H, H), lambda i: (0, 0)),         # W_sim[:, H:]
                pl.BlockSpec((1, H), lambda i: (0, 0)),         # bias
            ],
            out_specs=pl.BlockSpec((tm, H), lambda i: (i, 0)),
            compiler_params=pltpu.CompilerParams(**ckw),
            cost_estimate=cost,
        )(x1, x2, w_one, w_a, w_b, b2)

    return out.reshape(*lead, H)


# --------------------------------------------------------------------------
# Reference & demo
# --------------------------------------------------------------------------
def _reference_forward(feature_1, feature_2, w_one, w_sim, b_sim):
    """Pure-JAX reference matching the PyTorch module (full f32 precision)."""
    hi = lax.Precision.HIGHEST

    def leaky(x):
        return jnp.where(x > 0, x, 0.01 * x)

    one_out = leaky(jnp.matmul(feature_1, w_one.T, precision=hi))
    two_out = leaky(jnp.matmul(feature_2, w_one.T, precision=hi))
    cat = jnp.concatenate([one_out, two_out], axis=-1)
    return jnp.matmul(cat, w_sim.T, precision=hi) + b_sim


def _init_params(key, feature_hidden):
    """Deterministic PyTorch-style init: U(-1/sqrt(fan_in), +1/sqrt(fan_in))."""
    k1, k2, k3, k4 = jax.random.split(key, 4)
    H = feature_hidden
    bound1 = 1.0 / np.sqrt(H)
    bound2 = 1.0 / np.sqrt(2 * H)
    w_one = jax.random.uniform(k1, (H, H), jnp.float32, -bound1, bound1)
    # two_linear exists in __init__ but is unused in forward; created only for
    # shape fidelity, never touches the kernel.
    w_two = jax.random.uniform(k2, (H, H), jnp.float32, -bound1, bound1)  # noqa: F841
    w_sim = jax.random.uniform(k3, (H, 2 * H), jnp.float32, -bound2, bound2)
    b_sim = jax.random.uniform(k4, (H,), jnp.float32, -bound2, bound2)
    return w_one, w_sim, b_sim


if __name__ == "__main__":
    feature_hidden = 32
    batch, seq = 2, 8          # feature_1/feature_2: (batch, seq, hidden)

    key = jax.random.PRNGKey(0)
    kx1, kx2, kp = jax.random.split(key, 3)

    feature_1 = jax.random.normal(kx1, (batch, seq, feature_hidden), jnp.float32)
    feature_2 = jax.random.normal(kx2, (batch, seq, feature_hidden), jnp.float32)
    w_one, w_sim, b_sim = _init_params(kp, feature_hidden)

    out = crime_similarity_forward(feature_1, feature_2, w_one, w_sim, b_sim)
    out = jax.block_until_ready(out)

    ref = _reference_forward(feature_1, feature_2, w_one, w_sim, b_sim)
    assert out.shape == (batch, seq, feature_hidden)
    np.testing.assert_allclose(np.asarray(out), np.asarray(ref),
                               rtol=2e-5, atol=2e-5)
    print("KERNEL_OK")
</pallas_src>

<mosaic_0001>
module attributes {stable_mosaic.version = 11 : i64} {
  func.func @_fused_packed_kernel(%arg0: i32, %arg1: memref<8x256xf32, #tpu.memory_space<vmem>>, %arg2: memref<256x256xf32, #tpu.memory_space<vmem>>, %arg3: memref<128x256xf32, #tpu.memory_space<vmem>>, %arg4: memref<1x128xf32, #tpu.memory_space<vmem>>, %arg5: memref<8x128xf32, #tpu.memory_space<vmem>>) attributes {dimension_semantics = [#tpu.dimension_semantics<parallel>], iteration_bounds = array<i64: 1>, scalar_prefetch = 0 : i64, scratch_operands = 0 : i64, tpu.core_type = #tpu.core_type<tc>, window_params = [{transform_indices = @transform_0, window_bounds = array<i64: 8, 256>}, {pipeline_mode = #tpu.pipeline_mode<synchronous>, transform_indices = @transform_1, window_bounds = array<i64: 256, 256>}, {pipeline_mode = #tpu.pipeline_mode<synchronous>, transform_indices = @transform_2, window_bounds = array<i64: 128, 256>}, {pipeline_mode = #tpu.pipeline_mode<synchronous>, transform_indices = @transform_3, window_bounds = array<i64: 1, 128>}, {transform_indices = @transform_4, window_bounds = array<i64: 8, 128>}]} {
    %c0 = arith.constant 0 : index
    %c0_0 = arith.constant 0 : index
    %0 = vector.load %arg1[%c0, %c0_0] : memref<8x256xf32, #tpu.memory_space<vmem>>, vector<8x256xf32>
    %c0_1 = arith.constant 0 : index
    %c0_2 = arith.constant 0 : index
    %1 = vector.load %arg2[%c0_1, %c0_2] : memref<256x256xf32, #tpu.memory_space<vmem>>, vector<256x256xf32>
    %cst = arith.constant dense<0.000000e+00> : vector<8x256xf32>
    %2 = tpu.matmul %0, %1, %cst {dimension_numbers = #tpu.dot_dimension_numbers<[1], [1], [0], [0], [0, 0, 1, 0], [], []>} : vector<8x256xf32>, vector<256x256xf32>, vector<8x256xf32> -> vector<8x256xf32>
    %cst_3 = arith.constant 0.000000e+00 : f32
    %3 = vector.broadcast %cst_3 : f32 to vector<8x256xf32>
    %4 = arith.cmpf ogt, %2, %3 : vector<8x256xf32>
    %cst_4 = arith.constant 0.00999999977 : f32
    %5 = vector.broadcast %cst_4 : f32 to vector<8x256xf32>
    %6 = arith.mulf %5, %2 : vector<8x256xf32>
    %7 = arith.select %4, %2, %6 : vector<8x256xi1>, vector<8x256xf32>
    %c0_5 = arith.constant 0 : index
    %c0_6 = arith.constant 0 : index
    %8 = vector.load %arg3[%c0_5, %c0_6] : memref<128x256xf32, #tpu.memory_space<vmem>>, vector<128x256xf32>
    %cst_7 = arith.constant dense<0.000000e+00> : vector<8x128xf32>
    %9 = tpu.matmul %7, %8, %cst_7 {dimension_numbers = #tpu.dot_dimension_numbers<[1], [1], [0], [0], [0, 0, 1, 0], [], []>} : vector<8x256xf32>, vector<128x256xf32>, vector<8x128xf32> -> vector<8x128xf32>
    %c0_8 = arith.constant 0 : index
    %c0_9 = arith.constant 0 : index
    %10 = vector.load %arg4[%c0_8, %c0_9] : memref<1x128xf32, #tpu.memory_space<vmem>>, vector<1x128xf32>
    %11 = vector.broadcast %10 : vector<1x128xf32> to vector<8x128xf32>
    %12 = arith.addf %9, %11 : vector<8x128xf32>
    %c0_10 = arith.constant 0 : index
    %c0_11 = arith.constant 0 : index
    %13 = vector.load %arg5[%c0_10, %c0_11] : memref<8x128xf32, #tpu.memory_space<vmem>>, vector<8x128xf32>
    tpu.vector_store %arg5[%c0_10, %c0_11], %12 {strides = array<i32>} : memref<8x128xf32, #tpu.memory_space<vmem>>, vector<8x128xf32>,
    return
  }
  func.func @transform_0(%arg0: i32) -> (i32, i32) {
    %c0_i32 = arith.constant 0 : i32
    %c0_i32_0 = arith.constant 0 : i32
    return %arg0, %c0_i32 : i32, i32
  }
  func.func @transform_1(%arg0: i32) -> (i32, i32) {
    %c0_i32 = arith.constant 0 : i32
    %c0_i32_0 = arith.constant 0 : i32
    %c0_i32_1 = arith.constant 0 : i32
    return %c0_i32, %c0_i32_0 : i32, i32
  }
  func.func @transform_2(%arg0: i32) -> (i32, i32) {
    %c0_i32 = arith.constant 0 : i32
    %c0_i32_0 = arith.constant 0 : i32
    %c0_i32_1 = arith.constant 0 : i32
    return %c0_i32, %c0_i32_0 : i32, i32
  }
  func.func @transform_3(%arg0: i32) -> (i32, i32) {
    %c0_i32 = arith.constant 0 : i32
    %c0_i32_0 = arith.constant 0 : i32
    %c0_i32_1 = arith.constant 0 : i32
    return %c0_i32, %c0_i32_0 : i32, i32
  }
  func.func @transform_4(%arg0: i32) -> (i32, i32) {
    %c0_i32 = arith.constant 0 : i32
    %c0_i32_0 = arith.constant 0 : i32
    return %arg0, %c0_i32 : i32, i32
  }
}

</mosaic_0001>

<bundles_post_ra>
// kernel: tpu_custom_call.1
= control target key start
LH: loop header
LB: loop body
LE: loop exit
PB: predicated region body
PF: predicated region fallthrough
CT: control target
= control target key end

     0   :  { %9 = vsyncpa [#allocation3], 0  ;;  %s611_s0 = inlined_call_operand.hbm [shape: f32[8,256], index: 0, kind: input, shape index: {}]   ;;  %s612_s1 = inlined_call_operand.hbm [shape: f32[256,256], index: 1, kind: input, shape index: {}]   ;;  %s613_s2 = inlined_call_operand.hbm [shape: f32[128,256], index: 2, kind: input, shape index: {}]   ;;  %s614_s3 = inlined_call_operand.vmem [shape: f32[1,128], index: 3, kind: input, shape index: {}]   ;;  %s615_s4 = inlined_call_operand.hbm [shape: f32[8,128], index: 4, kind: output, shape index: {}]  }
   0x1   :  { %10 = vsyncpa [#allocation6], 0 }
   0x2   :  { %11 = vsyncpa [#allocation4], 0  ;;  %s523_s15 = smov [#allocation5]   ;;  %s429_s19 = scalar_lea.hbm %s612_s1, 8192 }
   0x3   :  { %s27_s16 = sshll.u32 %s523_s15, 4  ;;  %p430_p0 = scmp.ne.s32.totalorder %s612_s1, %s429_s19  ;;  %s28_s16 = int_to_ptr.vmem [resolvable:$true] %s27_s16 }
   0x4   :  { %p433_p1 = scmp.lt.u32.totalorder %s429_s19, %s612_s1 }
   0x6   :  { %p435_p2 = pnand %p433_p1, %p430_p0 }
   0x8   :  { %438 = shalt.err (!%p435_p2)
}
   0x9   :  { %s439_s24 = scalar_lea.vmem %s28_s16, 8192  ;;  %p444_p4 = scmp.lt.s32.totalorder %s28_s16, %s28_s16 }
   0xa   :  { %p440_p3 = scmp.ne.s32.totalorder %s28_s16, %s439_s24  ;;  %p445_p5 = scmp.lt.s32.totalorder %s439_s24, %s439_s24 }
   0xc   :  { %p446_p6 = por %p445_p5, %p444_p4 }
   0xe   :  { %p447_p7 = pnand %p446_p6, %p440_p3 }
  0x10   :  { %450 = shalt.err (!%p447_p7)
}
  0x11   :  { %s524_s25 = smov 256   ;;  %s525_s26 = smov 16  }
  0x12   :  { %33 = dma.hbm_to_vmem [thread:$0]  %s612_s1, 8192, %s28_s16, [#allocation6], %s524_s25, %s524_s25, %s525_s26  }
  0x13   :  { %s526_s29 = smov [#allocation2]   ;;  %s527_s5 = smov [#allocation7]  }
  0x14   :  { %s18_s30 = sshll.u32 %s526_s29, 4  ;;  %s39_s6 = sshll.u32 %s527_s5, 4  ;;  %s19_s30 = int_to_ptr.vmem [resolvable:$true] %s18_s30  ;;  %s40_s6 = int_to_ptr.vmem [resolvable:$true] %s39_s6 }
  0x15   :  { %s451_s9 = scalar_lea.hbm %s611_s0, 256 }
  0x16   :  { %p452_p8 = scmp.ne.s32.totalorder %s611_s0, %s451_s9  ;;  %p455_p9 = scmp.lt.u32.totalorder %s451_s9, %s611_s0 }
  0x18   :  { %p457_p10 = pnand %p455_p9, %p452_p8 }
  0x1a   :  { %460 = shalt.err (!%p457_p10)
}
  0x1b   :  { %s461_s1 = scalar_lea.vmem %s19_s30, 256  ;;  %p466_p12 = scmp.lt.s32.totalorder %s19_s30, %s19_s30 }
  0x1c   :  { %p462_p11 = scmp.ne.s32.totalorder %s19_s30, %s461_s1  ;;  %p467_p13 = scmp.lt.s32.totalorder %s461_s1, %s461_s1 }
  0x1e   :  { %p468_p0 = por %p467_p13, %p466_p12 }
  0x20   :  { %p469_p1 = pnand %p468_p0, %p462_p11 }
  0x22   :  { %472 = shalt.err (!%p469_p1)
}
  0x23   :  { %21 = dma.hbm_to_vmem [thread:$0]  %s611_s0, 256, %s19_s30, [#allocation3]  }
  0x24   :  { %s473_s18 = scalar_lea.hbm %s613_s2, 4096 }
  0x25   :  { %p474_p2 = scmp.ne.s32.totalorder %s613_s2, %s473_s18  ;;  %p477_p3 = scmp.lt.u32.totalorder %s473_s18, %s613_s2 }
  0x27   :  { %p479_p4 = pnand %p477_p3, %p474_p2 }
  0x29   :  { %482 = shalt.err (!%p479_p4)
}
  0x2a   :  { %s483_s23 = scalar_lea.vmem %s40_s6, 4096  ;;  %p488_p6 = scmp.lt.s32.totalorder %s40_s6, %s40_s6 }
  0x2b   :  { %p484_p5 = scmp.ne.s32.totalorder %s40_s6, %s483_s23  ;;  %p489_p7 = scmp.lt.s32.totalorder %s483_s23, %s483_s23 }
  0x2d   :  { %p490_p8 = por %p489_p7, %p488_p6 }
  0x2f   :  { %p491_p9 = pnand %p490_p8, %p484_p5 }
  0x31   :  { %494 = shalt.err (!%p491_p9)
}
  0x32   :  { %45 = dma.hbm_to_vmem [thread:$0]  %s613_s2, 4096, %s40_s6, [#allocation6], %s524_s25, %s524_s25, %s525_s26  }
  0x33   :  { %517 = dma.done.wait [#allocation3], 256  }
  0x34   :  { %518 = vsyncadd [#allocation3], 4294967040 }
  0x35   :  { %519 = dma.done.wait [#allocation6], 12288  }
  0x36   :  { %520 = vsyncadd [#allocation6], 4294955008  ;;  %v60_v0 = vld [vmem:[#allocation5 + $0x8] sm:$0xff]  ;;  %v62_v1 = vld [vmem:[#allocation5 + $0x18] sm:$0xff]  ;;  %s528_s26 = smov [#allocation8]  }
  0x37   :  { %v59_v2 = vld [vmem:[#allocation5] sm:$0xff]  ;;  %v327_v3 = vpack.c.bf16 %v62_v1, %v60_v0  ;;  %v61_v4 = vld [vmem:[#allocation5 + $0x10] sm:$0xff]  ;;  %v64_v5 = vld [vmem:[#allocation5 + $0x28] sm:$0xff]  ;;  %s316_s27 = sshll.u32 %s528_s26, 4  ;;  %s317_s27 = int_to_ptr.vmem [resolvable:$true] %s316_s27 }
  0x38   :  { %v66_v6 = vld [vmem:[#allocation5 + $0x38] sm:$0xff]  ;;  %v329_v7 = vpack.c.bf16 %v61_v4, %v59_v2  ;;  %v63_v9 = vld [vmem:[#allocation5 + $0x20] sm:$0xff]  ;;  %v65_v10 = vld [vmem:[#allocation5 + $0x30] sm:$0xff]  ;;  %s495_s28 = scalar_lea.vmem %s317_s27, 128  ;;  %p500_p11 = scmp.lt.s32.totalorder %s317_s27, %s317_s27 }
  0x39   :  { %v331_v8 = vpack.c.bf16 %v66_v6, %v64_v5  ;;  %328 = vmatprep.subr.bf16.mxu0 %v327_v3  ;;  %v68_v11 = vld [vmem:[#allocation5 + $0x48] sm:$0xff]  ;;  %v70_v12 = vld [vmem:[#allocation5 + $0x58] sm:$0xff]  ;;  %v333_v13 = vpack.c.bf16 %v65_v10, %v63_v9  ;;  %v67_v15 = vld [vmem:[#allocation5 + $0x40] sm:$0xff]  ;;  %p496_p10 = scmp.ne.s32.totalorder %s317_s27, %s495_s28  ;;  %p501_p12 = scmp.lt.s32.totalorder %s495_s28, %s495_s28 }
  0x3a   :  { %330 = vmatpush1.bf16.xpose.msra.mxu0 %v329_v7  ;;  %v335_v14 = vpack.c.bf16 %v70_v12, %v68_v11  ;;  %v69_v16 = vld [vmem:[#allocation5 + $0x50] sm:$0xff]  ;;  %v72_v17 = vld [vmem:[#allocation5 + $0x68] sm:$0xff]  ;;  %v74_v18 = vld [vmem:[#allocation5 + $0x78] sm:$0xff] }
  0x3b   :  { %332 = vmatprep.subr.bf16.mxu0 %v331_v8  ;;  %v337_v19 = vpack.c.bf16 %v69_v16, %v67_v15  ;;  %v339_v20 = vpack.c.bf16 %v74_v18, %v72_v17  ;;  %v71_v21 = vld [vmem:[#allocation5 + $0x60] sm:$0xff]  ;;  %v73_v22 = vld [vmem:[#allocation5 + $0x70] sm:$0xff]  ;;  %v76_v23 = vld [vmem:[#allocation5 + $0x88] sm:$0xff]  ;;  %p502_p13 = por %p501_p12, %p500_p11 }
  0x3c   :  { %v78_v24 = vld [vmem:[#allocation5 + $0x98] sm:$0xff]  ;;  %v201_v26 = vld [vmem:[#allocation7 + $0x8] sm:$0xff]  ;;  %v200_v28 = vld [vmem:[#allocation7] sm:$0xff]  ;;  %v341_v33 = vpack.c.bf16 %v73_v22, %v71_v21 }
  0x3d   :  { %v58_v25 = vld [vmem:[#allocation2 + $0x8] sm:$0xff]  ;;  %v202_v30 = vld [vmem:[#allocation7 + $0x10] sm:$0xff]  ;;  %v205_v31 = vld [vmem:[#allocation7 + $0x28] sm:$0xff]  ;;  %v343_v36 = vpack.c.bf16 %v78_v24, %v76_v23  ;;  %p503_p0 = pnand %p502_p13, %p496_p10 }
  0x3e   :  { %187 = vmatprep.mubr.f32.mxu0 %v58_v25  ;;  %v203_v27 = vld [vmem:[#allocation7 + $0x18] sm:$0xff]  ;;  %v393_v34 = vpack.c.bf16 %v202_v30, %v200_v28  ;;  %v204_v37 = vld [vmem:[#allocation7 + $0x20] sm:$0xff]  ;;  %v206_v38 = vld [vmem:[#allocation7 + $0x30] sm:$0xff] }
  0x3f   :  { %v391_v29 = vpack.c.bf16 %v203_v27, %v201_v26  ;;  %v207_v32 = vld [vmem:[#allocation7 + $0x38] sm:$0xff]  ;;  %v209_v39 = vld [vmem:[#allocation7 + $0x48] sm:$0xff]  ;;  %v75_v41 = vld [vmem:[#allocation5 + $0x80] sm:$0xff]  ;;  %v397_v45 = vpack.c.bf16 %v206_v38, %v204_v37 }
  0x40   :  { %v395_v35 = vpack.c.bf16 %v207_v32, %v205_v31  ;;  %v211_v40 = vld [vmem:[#allocation7 + $0x58] sm:$0xff]  ;;  %v77_v42 = vld [vmem:[#allocation5 + $0x90] sm:$0xff]  ;;  %v80_v43 = vld [vmem:[#allocation5 + $0xa8] sm:$0xff] }
  0x41   :  { %392 = vmatprep.subr.bf16.mxu1 %v391_v29  ;;  %v82_v44 = vld [vmem:[#allocation5 + $0xb8] sm:$0xff]  ;;  %v399_v46 = vpack.c.bf16 %v211_v40, %v209_v39  ;;  %v345_v47 = vpack.c.bf16 %v77_v42, %v75_v41  ;;  %v208_v49 = vld [vmem:[#allocation7 + $0x40] sm:$0xff]  ;;  %v210_v50 = vld [vmem:[#allocation7 + $0x50] sm:$0xff] }
  0x42   :  { %334 = vmatpush1.bf16.xpose.msra.mxu0 %v333_v13  ;;  %394 = vmatpush1.bf16.xpose.msra.mxu1 %v393_v34  ;;  %v347_v48 = vpack.c.bf16 %v82_v44, %v80_v43  ;;  %v213_v51 = vld [vmem:[#allocation7 + $0x68] sm:$0xff]  ;;  %v215_v52 = vld [vmem:[#allocation7 + $0x78] sm:$0xff]  ;;  %v79_v53 = vld [vmem:[#allocation5 + $0xa0] sm:$0xff]  ;;  %v401_v57 = vpack.c.bf16 %v210_v50, %v208_v49 }
  0x43   :  { %336 = vmatprep.subr.bf16.mxu0 %v335_v14  ;;  %396 = vmatprep.subr.bf16.mxu1 %v395_v35  ;;  %v81_v54 = vld [vmem:[#allocation5 + $0xb0] sm:$0xff]  ;;  %v84_v55 = vld [vmem:[#allocation5 + $0xc8] sm:$0xff]  ;;  %v86_v56 = vld [vmem:[#allocation5 + $0xd8] sm:$0xff]  ;;  %v403_v58 = vpack.c.bf16 %v215_v52, %v213_v51 }
  0x44   :  { %v349_v59 = vpack.c.bf16 %v81_v54, %v79_v53  ;;  %v351_v60 = vpack.c.bf16 %v86_v56, %v84_v55  ;;  %v212_v61 = vld [vmem:[#allocation7 + $0x60] sm:$0xff]  ;;  %v214_v62 = vld [vmem:[#allocation7 + $0x70] sm:$0xff]  ;;  %v217_v63 = vld [vmem:[#allocation7 + $0x88] sm:$0xff] }
  0x45   :  { %v219_v0 = vld [vmem:[#allocation7 + $0x98] sm:$0xff]  ;;  %v83_v1 = vld [vmem:[#allocation5 + $0xc0] sm:$0xff]  ;;  %v85_v2 = vld [vmem:[#allocation5 + $0xd0] sm:$0xff]  ;;  %v405_v5 = vpack.c.bf16 %v214_v62, %v212_v61 }
  0x46   :  { %v88_v3 = vld [vmem:[#allocation5 + $0xe8] sm:$0xff]  ;;  %v90_v4 = vld [vmem:[#allocation5 + $0xf8] sm:$0xff]  ;;  %v407_v6 = vpack.c.bf16 %v219_v0, %v217_v63  ;;  %v353_v7 = vpack.c.bf16 %v85_v2, %v83_v1  ;;  %v216_v9 = vld [vmem:[#allocation7 + $0x80] sm:$0xff] }
  0x47   :  { %v355_v8 = vpack.c.bf16 %v90_v4, %v88_v3  ;;  %v218_v10 = vld [vmem:[#allocation7 + $0x90] sm:$0xff]  ;;  %v221_v11 = vld [vmem:[#allocation7 + $0xa8] sm:$0xff]  ;;  %v223_v12 = vld [vmem:[#allocation7 + $0xb8] sm:$0xff] }
  0x48   :  { %v87_v13 = vld [vmem:[#allocation5 + $0xe0] sm:$0xff]  ;;  %v89_v14 = vld [vmem:[#allocation5 + $0xf0] sm:$0xff]  ;;  %v92_v15 = vld [vmem:[#allocation5 + $0x108] sm:$0xff]  ;;  %v409_v17 = vpack.c.bf16 %v218_v10, %v216_v9  ;;  %v411_v18 = vpack.c.bf16 %v223_v12, %v221_v11 }
  0x49   :  { %v94_v16 = vld [vmem:[#allocation5 + $0x118] sm:$0xff]  ;;  %v220_v21 = vld [vmem:[#allocation7 + $0xa0] sm:$0xff]  ;;  %v222_v22 = vld [vmem:[#allocation7 + $0xb0] sm:$0xff] }
  0x4a   :  { %338 = vmatpush1.bf16.xpose.msra.mxu0 %v337_v19  ;;  %398 = vmatpush1.bf16.xpose.msra.mxu1 %v397_v45  ;;  %v357_v19 = vpack.c.bf16 %v89_v14, %v87_v13  ;;  %v225_v23 = vld [vmem:[#allocation7 + $0xc8] sm:$0xff]  ;;  %v227_v24 = vld [vmem:[#allocation7 + $0xd8] sm:$0xff]  ;;  %v91_v25 = vld [vmem:[#allocation5 + $0x100] sm:$0xff]  ;;  %v413_v29 = vpack.c.bf16 %v222_v22, %v220_v21 }
  0x4b   :  { %340 = vmatprep.subr.bf16.mxu0 %v339_v20  ;;  %400 = vmatprep.subr.bf16.mxu1 %v399_v46  ;;  %v359_v20 = vpack.c.bf16 %v94_v16, %v92_v15  ;;  %v93_v26 = vld [vmem:[#allocation5 + $0x110] sm:$0xff]  ;;  %v96_v27 = vld [vmem:[#allocation5 + $0x128] sm:$0xff]  ;;  %v98_v28 = vld [vmem:[#allocation5 + $0x138] sm:$0xff]  ;;  %v415_v30 = vpack.c.bf16 %v227_v24, %v225_v23 }
  0x4c   :  { %v361_v31 = vpack.c.bf16 %v93_v26, %v91_v25  ;;  %v363_v32 = vpack.c.bf16 %v98_v28, %v96_v27  ;;  %v226_v34 = vld [vmem:[#allocation7 + $0xd0] sm:$0xff]  ;;  %v229_v35 = vld [vmem:[#allocation7 + $0xe8] sm:$0xff]  ;;  %v95_v37 = vld [vmem:[#allocation5 + $0x120] sm:$0xff] }
  0x4d   :  { %v97_v38 = vld [vmem:[#allocation5 + $0x130] sm:$0xff]  ;;  %v100_v39 = vld [vmem:[#allocation5 + $0x148] sm:$0xff]  ;;  %v102_v40 = vld [vmem:[#allocation5 + $0x158] sm:$0xff] }
  0x4e   :  { %v365_v43 = vpack.c.bf16 %v97_v38, %v95_v37  ;;  %v367_v44 = vpack.c.bf16 %v102_v40, %v100_v39  ;;  %v228_v45 = vld [vmem:[#allocation7 + $0xe0] sm:$0xff]  ;;  %v230_v46 = vld [vmem:[#allocation7 + $0xf0] sm:$0xff]  ;;  %v104_v49 = vld [vmem:[#allocation5 + $0x168] sm:$0xff] }
  0x4f   :  { %v106_v50 = vld [vmem:[#allocation5 + $0x178] sm:$0xff]  ;;  %v421_v51 = vpack.c.bf16 %v230_v46, %v228_v45  ;;  %v103_v54 = vld [vmem:[#allocation5 + $0x160] sm:$0xff]  ;;  %v105_v55 = vld [vmem:[#allocation5 + $0x170] sm:$0xff] }
  0x50   :  { %v371_v53 = vpack.c.bf16 %v106_v50, %v104_v49  ;;  %v108_v56 = vld [vmem:[#allocation5 + $0x188] sm:$0xff]  ;;  %v109_v61 = vld [vmem:[#allocation5 + $0x190] sm:$0xff]  ;;  %v114_v63 = vld [vmem:[#allocation5 + $0x1b8] sm:$0xff] }
  0x51   :  { %v112_v62 = vld [vmem:[#allocation5 + $0x1a8] sm:$0xff]  ;;  %v111_v2 = vld [vmem:[#allocation5 + $0x1a0] sm:$0xff]  ;;  %v113_v3 = vld [vmem:[#allocation5 + $0x1b0] sm:$0xff] }
  0x52   :  { %342 = vmatpush1.bf16.xpose.msra.mxu0 %v341_v33  ;;  %402 = vmatpush1.bf16.xpose.msra.mxu1 %v401_v57  ;;  %v224_v33 = vld [vmem:[#allocation7 + $0xc0] sm:$0xff]  ;;  %v110_v57 = vld [vmem:[#allocation5 + $0x198] sm:$0xff]  ;;  %v379_v1 = vpack.c.bf16 %v114_v63, %v112_v62  ;;  %v116_v4 = vld [vmem:[#allocation5 + $0x1c8] sm:$0xff] }
  0x53   :  { %344 = vmatprep.subr.bf16.mxu0 %v343_v36  ;;  %404 = vmatprep.subr.bf16.mxu1 %v403_v58  ;;  %v231_v36 = vld [vmem:[#allocation7 + $0xf8] sm:$0xff]  ;;  %v417_v41 = vpack.c.bf16 %v226_v34, %v224_v33  ;;  %v373_v58 = vpack.c.bf16 %v105_v55, %v103_v54  ;;  %v117_v9 = vld [vmem:[#allocation5 + $0x1d0] sm:$0xff]  ;;  %v120_v10 = vld [vmem:[#allocation5 + $0x1e8] sm:$0xff] }
  0x54   :  { %v419_v42 = vpack.c.bf16 %v231_v36, %v229_v35  ;;  %v122_v11 = vld [vmem:[#allocation5 + $0x1f8] sm:$0xff]  ;;  %v119_v14 = vld [vmem:[#allocation5 + $0x1e0] sm:$0xff]  ;;  %v121_v15 = vld [vmem:[#allocation5 + $0x1f0] sm:$0xff] }
  0x55   :  { %v387_v13 = vpack.c.bf16 %v122_v11, %v120_v10  ;;  %v389_v16 = vpack.c.bf16 %v121_v15, %v119_v14  ;;  %v326_v24 = vld [vmem:[%s614_s3] ss:$0 sm:$0xff] }
  0x5a   :  { %346 = vmatpush1.bf16.xpose.msra.mxu0 %v345_v47  ;;  %406 = vmatpush1.bf16.xpose.msra.mxu1 %v405_v5  ;;  %v99_v47 = vld [vmem:[#allocation5 + $0x140] sm:$0xff]  ;;  %v118_v5 = vld [vmem:[#allocation5 + $0x1d8] sm:$0xff] }
  0x5b   :  { %348 = vmatprep.subr.bf16.mxu0 %v347_v48  ;;  %408 = vmatprep.subr.bf16.mxu1 %v407_v6  ;;  %v101_v48 = vld [vmem:[#allocation5 + $0x150] sm:$0xff]  ;;  %v381_v6 = vpack.c.bf16 %v113_v3, %v111_v2 }
  0x5c   :  { %v369_v52 = vpack.c.bf16 %v101_v48, %v99_v47 }
  0x62   :  { %350 = vmatpush1.bf16.xpose.msra.mxu0 %v349_v59  ;;  %410 = vmatpush1.bf16.xpose.msra.mxu1 %v409_v17  ;;  %v375_v59 = vpack.c.bf16 %v110_v57, %v108_v56  ;;  %v57_v17 = vld [vmem:[#allocation2] sm:$0xff] }
  0x63   :  { %352 = vmatprep.subr.bf16.mxu0 %v351_v60  ;;  %412 = vmatprep.subr.bf16.mxu1 %v411_v18  ;;  %v107_v60 = vld [vmem:[#allocation5 + $0x180] sm:$0xff] }
  0x64   :  { %v377_v0 = vpack.c.bf16 %v109_v61, %v107_v60 }
  0x6a   :  { %354 = vmatpush1.bf16.xpose.msra.mxu0 %v353_v7  ;;  %414 = vmatpush1.bf16.xpose.msra.mxu1 %v413_v29  ;;  %v383_v7 = vpack.c.bf16 %v118_v5, %v116_v4 }
  0x6b   :  { %356 = vmatprep.subr.bf16.mxu0 %v355_v8  ;;  %416 = vmatprep.subr.bf16.mxu1 %v415_v30  ;;  %v115_v8 = vld [vmem:[#allocation5 + $0x1c0] sm:$0xff] }
  0x6c   :  { %v385_v12 = vpack.c.bf16 %v117_v9, %v115_v8 }
  0x72   :  { %358 = vmatpush1.bf16.xpose.msra.mxu0 %v357_v19  ;;  %418 = vmatpush1.bf16.xpose.msra.mxu1 %v417_v41 }
  0x73   :  { %360 = vmatprep.subr.bf16.mxu0 %v359_v20  ;;  %420 = vmatprep.subr.bf16.mxu1 %v419_v42 }
  0x7a   :  { %362 = vmatpush1.bf16.xpose.msra.mxu0 %v361_v31  ;;  %422 = vmatpush1.bf16.xpose.msra.mxu1 %v421_v51 }
  0x7b   :  { %364 = vmatprep.subr.bf16.mxu0 %v363_v32 }
  0x82   :  { %366 = vmatpush1.bf16.xpose.msra.mxu0 %v365_v43 }
  0x83   :  { %368 = vmatprep.subr.bf16.mxu0 %v367_v44 }
  0x8a   :  { %370 = vmatpush1.bf16.xpose.msra.mxu0 %v369_v52 }
  0x8b   :  { %372 = vmatprep.subr.bf16.mxu0 %v371_v53 }
  0x92   :  { %374 = vmatpush1.bf16.xpose.msra.mxu0 %v373_v58 }
  0x93   :  { %376 = vmatprep.subr.bf16.mxu0 %v375_v59 }
  0x9a   :  { %378 = vmatpush1.bf16.xpose.msra.mxu0 %v377_v0 }
  0x9b   :  { %380 = vmatprep.subr.bf16.mxu0 %v379_v1 }
  0xa2   :  { %382 = vmatpush1.bf16.xpose.msra.mxu0 %v381_v6 }
  0xa3   :  { %384 = vmatprep.subr.bf16.mxu0 %v383_v7 }
  0xaa   :  { %386 = vmatpush1.bf16.xpose.msra.mxu0 %v385_v12 }
  0xab   :  { %388 = vmatprep.subr.bf16.mxu0 %v387_v13 }
  0xb2   :  { %390 = vmatpush1.bf16.xpose.msra.mxu0 %v389_v16 }
  0xb9   :  { %188 = vmatmul.mubr.f32.vlgmr.msra.gmra.mrb[0].mxu0 %v57_v17 }
 0x18c   :  { %v189_v18 = vpop.f32.mrb[0].mxu0 }
 0x18d   :  { %v196_v19 = vmul.f32 0.01, %v189_v18  ;;  %v191_v20 = vpop.f32.mrb[1].mxu0  ;;  %vm194_vm0 = vcmp.gt.f32.partialorder %v189_v18, 0.0 }
 0x18e   :  { %vm195_vm1 = vcmp.gt.f32.partialorder %v191_v20, 0.0  ;;  %v197_v21 = vmul.f32 0.01, %v191_v20 }
 0x18f   :  { %v198_v23 = vsel %vm194_vm0, %v189_v18, %v196_v19 }
 0x190   :  { %v199_v22 = vsel %vm195_vm1, %v191_v20, %v197_v21 }
 0x191   :  { %303 = vmatprep.mubr.f32.mxu1 %v199_v22 }
 0x192   :  { %304 = vmatmul.mubr.f32.vlgmr.msra.gmra.mrb[0].mxu1 %v198_v23 }
 0x265   :  { %v305_v25 = vpop.f32.mrb[0].mxu1 }
 0x266   :  { %v306_v26 = vadd.f32 %v326_v24, %v305_v25  ;;  %v307_v27 = vpop.f32.mrb[1].mxu1 }
 0x268   :  { %309 = vst [vmem:[#allocation8] sm:$0xff] %v306_v26 }
 0x269   :  { %506 = shalt.err (!%p503_p0)
}
 0x26a   :  { %s507_s5 = scalar_lea.hbm %s615_s4, 128 }
 0x26b   :  { %p508_p1 = scmp.ne.s32.totalorder %s615_s4, %s507_s5  ;;  %p511_p2 = scmp.lt.u32.totalorder %s507_s5, %s615_s4 }
 0x26d   :  { %p513_p3 = pnand %p511_p2, %p508_p1 }
 0x26f   :  { %516 = shalt.err (!%p513_p3)
}
 0x270   :  { %319 = dma.vmem_to_hbm [thread:$0]  %s317_s27, 128, %s615_s4, [#allocation4]  }
 0x271   :  { %521 = dma.done.wait [#allocation4], 128  }
 0x272   :  { %522 = vsyncadd [#allocation4], 4294967168 }
 0x273   :  { %323 = vsyncpa [#allocation3], 1 }
 0x274   :  { %324 = vsyncpa [#allocation6], 1 }
 0x275   :  { %325 = vsyncpa [#allocation4], 1 }

</bundles_post_ra>
